<compile_context>
chip_gen: v7x
topology: tpu7x:2x2x1
jax: 0.10.0
libtpu: 0.0.40
codegen_flags: <defaults>
</compile_context>

<pallas_src>
import functools

import jax
import jax.numpy as jnp
from jax import lax
from jax.experimental import pallas as pl
from jax.experimental.pallas import tpu as pltpu

_LANES = 128
_SUBLANES = 8


def _resolve_block_rows(block_rows):
    """Chip-aware default tile height (rows of 128 boxes)."""
    if block_rows is not None:
        assert block_rows % _SUBLANES == 0
        return block_rows
    try:
        kind = jax.devices()[0].device_kind.lower()
    except Exception:  # pragma: no cover - defensive
        kind = ""
    # v6e / v7x: 32 MiB scoped-VMEM default -> 2048-row tiles (~18 MiB double
    # buffered) fit.  v5e (16 MiB scoped) and unknown chips -> 1024 (~9 MiB).
    if ("v6" in kind) or ("v7" in kind) or ("7x" in kind):
        return 2048
    return 1024


def _recip(x):
    # EUP approximate reciprocal + one Newton-Raphson step (~f32 accuracy).
    # Keeps the divide off the VALU slot without hurting numerics.
    r = pl.reciprocal(x, approx=True)
    return r * (2.0 - x * r)


def _iou_loss_kernel(pred_ref, tgt_ref, out_ref, *, loss_type, fused_sum,
                     n_valid, tile_rows):
    # SoA (4, TR, 128) tiles: every component is a lane/sublane-dense slab.
    px, py, pw, ph = pred_ref[0], pred_ref[1], pred_ref[2], pred_ref[3]
    tx, ty, tw, th = tgt_ref[0], tgt_ref[1], tgt_ref[2], tgt_ref[3]

    pw2, ph2 = pw * 0.5, ph * 0.5
    tw2, th2 = tw * 0.5, th * 0.5
    p_l, p_r = px - pw2, px + pw2
    p_t, p_b = py - ph2, py + ph2
    t_l, t_r = tx - tw2, tx + tw2
    t_t, t_b = ty - th2, ty + th2

    # Clamped intersection widths are equivalent to the reference's strict
    # `tl < br` mask (touching boxes give area_i == 0 either way).
    w_i = jnp.maximum(jnp.minimum(p_r, t_r) - jnp.maximum(p_l, t_l), 0.0)
    h_i = jnp.maximum(jnp.minimum(p_b, t_b) - jnp.maximum(p_t, t_t), 0.0)
    area_i = w_i * h_i

    area_p = pw * ph
    area_g = tw * th
    area_u = area_p + area_g - area_i
    iou = area_i * _recip(area_u + 1e-16)

    if loss_type == "iou":
        loss = 1.0 - iou * iou
    elif loss_type == "giou":
        c_w = jnp.maximum(p_r, t_r) - jnp.minimum(p_l, t_l)
        c_h = jnp.maximum(p_b, t_b) - jnp.minimum(p_t, t_t)
        area_c = c_w * c_h
        giou = iou - (area_c - area_u) * _recip(jnp.maximum(area_c, 1e-16))
        loss = 1.0 - jnp.clip(giou, -1.0, 1.0)
    else:
        raise ValueError(f"unknown loss_type: {loss_type}")

    if fused_sum:
        # Mask padded / out-of-range boxes (each padded zero box would add 1.0
        # and a partial last block may hold garbage rows), then emit one
        # (8, 128) partial sum per grid step.  Grid axis stays "parallel".
        rows = lax.broadcasted_iota(jnp.int32, loss.shape, 0)
        lanes = lax.broadcasted_iota(jnp.int32, loss.shape, 1)
        box_idx = (pl.program_id(0) * tile_rows + rows) * _LANES + lanes
        loss = jnp.where(box_idx < n_valid, loss, 0.0)
        partial = loss.reshape(tile_rows // _SUBLANES, _SUBLANES, _LANES)
        out_ref[0] = jnp.sum(partial, axis=0)
    else:
        out_ref[...] = loss


def _run_iou_kernel(pred_soa, tgt_soa, n, reduction, loss_type, tr, rows8):
    """pred_soa / tgt_soa: (4, rows8, 128) f32, boxes flattened row-major."""
    grid = pl.cdiv(rows8, tr)
    fused = reduction in ("mean", "sum")

    kernel = functools.partial(
        _iou_loss_kernel, loss_type=loss_type, fused_sum=fused,
        n_valid=n, tile_rows=tr)

    in_specs = [
        pl.BlockSpec((4, tr, _LANES), lambda i: (0, i, 0)),
        pl.BlockSpec((4, tr, _LANES), lambda i: (0, i, 0)),
    ]
    if fused:
        out_shape = jax.ShapeDtypeStruct((grid, _SUBLANES, _LANES), jnp.float32)
        out_specs = pl.BlockSpec((1, _SUBLANES, _LANES), lambda i: (i, 0, 0))
    else:
        out_shape = jax.ShapeDtypeStruct((rows8, _LANES), jnp.float32)
        out_specs = pl.BlockSpec((tr, _LANES), lambda i: (i, 0))

    out = pl.pallas_call(
        kernel,
        out_shape=out_shape,
        grid_spec=pltpu.PrefetchScalarGridSpec(
            num_scalar_prefetch=0,
            grid=(grid,),
            in_specs=in_specs,
            out_specs=out_specs,
        ),
        compiler_params=pltpu.CompilerParams(
            dimension_semantics=("parallel",),
        ),
    )(pred_soa, tgt_soa)

    if fused:
        total = out.sum()
        if reduction == "mean":
            return total / n
        return total
    return out.reshape(-1)[:n]


def _padded_geometry(n, block_rows):
    rows = max(pl.cdiv(n, _LANES), 1)
    rows8 = pl.cdiv(rows, _SUBLANES) * _SUBLANES          # pad rows to 8 only
    tr = min(block_rows, rows8)                            # multiple of 8
    return rows8, tr


@functools.partial(jax.jit, static_argnames=("reduction", "loss_type", "block_rows"))
def iou_loss_soa(pred_soa, target_soa, *, reduction="none", loss_type="iou",
                 block_rows=None):
    """Boxes already in SoA (4, N) layout: no transpose, zero-copy reshape when
    N % 1024 == 0 (otherwise a single small pad)."""
    assert pred_soa.shape == target_soa.shape and pred_soa.shape[0] == 4
    if loss_type not in ("iou", "giou"):
        raise ValueError(f"unknown loss_type: {loss_type}")
    block_rows = _resolve_block_rows(block_rows)

    pred_soa = pred_soa.astype(jnp.float32)
    target_soa = target_soa.astype(jnp.float32)
    n = pred_soa.shape[1]
    rows8, tr = _padded_geometry(n, block_rows)
    n_pad = rows8 * _LANES

    if n_pad != n:
        pred_soa = jnp.pad(pred_soa, ((0, 0), (0, n_pad - n)))
        target_soa = jnp.pad(target_soa, ((0, 0), (0, n_pad - n)))
    pred_soa = pred_soa.reshape(4, rows8, _LANES)
    target_soa = target_soa.reshape(4, rows8, _LANES)

    return _run_iou_kernel(pred_soa, target_soa, n, reduction, loss_type, tr, rows8)


@functools.partial(jax.jit, static_argnames=("reduction", "loss_type", "block_rows"))
def iou_loss(pred, target, *, reduction="none", loss_type="iou", block_rows=None):
    """PyTorch-parity entry point: boxes as (..., 4) AoS in (cx, cy, w, h)."""
    assert pred.shape[0] == target.shape[0]
    if loss_type not in ("iou", "giou"):
        raise ValueError(f"unknown loss_type: {loss_type}")
    block_rows = _resolve_block_rows(block_rows)

    pred = pred.reshape(-1, 4).astype(jnp.float32)
    target = target.reshape(-1, 4).astype(jnp.float32)
    n = pred.shape[0]
    rows8, tr = _padded_geometry(n, block_rows)
    n_pad = rows8 * _LANES

    # Single fused transpose+pad+reshape pass per tensor (AoS -> SoA slabs).
    # TODO(synk): producers that can emit SoA (4, N) should call iou_loss_soa
    # and skip this pass entirely.
    pred_t = jnp.pad(pred.T, ((0, 0), (0, n_pad - n))).reshape(4, rows8, _LANES)
    target_t = jnp.pad(target.T, ((0, 0), (0, n_pad - n))).reshape(4, rows8, _LANES)

    return _run_iou_kernel(pred_t, target_t, n, reduction, loss_type, tr, rows8)


def _iou_loss_ref(pred, target, *, reduction="none", loss_type="iou"):
    # Pure-JAX reference mirroring the PyTorch forward.
    pred = pred.reshape(-1, 4).astype(jnp.float32)
    target = target.reshape(-1, 4).astype(jnp.float32)
    tl = jnp.maximum(pred[:, :2] - pred[:, 2:] / 2, target[:, :2] - target[:, 2:] / 2)
    br = jnp.minimum(pred[:, :2] + pred[:, 2:] / 2, target[:, :2] + target[:, 2:] / 2)
    area_p = jnp.prod(pred[:, 2:], axis=1)
    area_g = jnp.prod(target[:, 2:], axis=1)
    en = jnp.prod((tl < br).astype(jnp.float32), axis=1)
    area_i = jnp.prod(br - tl, axis=1) * en
    area_u = area_p + area_g - area_i
    iou = area_i / (area_u + 1e-16)
    if loss_type == "iou":
        loss = 1 - iou ** 2
    elif loss_type == "giou":
        c_tl = jnp.minimum(pred[:, :2] - pred[:, 2:] / 2, target[:, :2] - target[:, 2:] / 2)
        c_br = jnp.maximum(pred[:, :2] + pred[:, 2:] / 2, target[:, :2] + target[:, 2:] / 2)
        area_c = jnp.prod(c_br - c_tl, axis=1)
        giou = iou - (area_c - area_u) / jnp.maximum(area_c, 1e-16)
        loss = 1 - jnp.clip(giou, -1.0, 1.0)
    if reduction == "mean":
        loss = loss.mean()
    elif reduction == "sum":
        loss = loss.sum()
    return loss


if __name__ == "__main__":
    key = jax.random.PRNGKey(0)
    k1, k2, k3, k4 = jax.random.split(key, 4)

    n_boxes = 16  # pred / target: (n_boxes, 4) boxes in (cx, cy, w, h)
    pred_xy = jax.random.uniform(k1, (n_boxes, 2), jnp.float32, 0.0, 10.0)
    pred_wh = jax.random.uniform(k2, (n_boxes, 2), jnp.float32, 0.5, 4.0)
    tgt_xy = jax.random.uniform(k3, (n_boxes, 2), jnp.float32, 0.0, 10.0)
    tgt_wh = jax.random.uniform(k4, (n_boxes, 2), jnp.float32, 0.5, 4.0)
    pred = jnp.concatenate([pred_xy, pred_wh], axis=1)
    target = jnp.concatenate([tgt_xy, tgt_wh], axis=1)

    ok = True
    # PyTorch-parity (N, 4) interface: every loss_type x reduction combo.
    for loss_type in ("iou", "giou"):
        for reduction in ("none", "mean", "sum"):
            out = iou_loss(pred, target, reduction=reduction, loss_type=loss_type)
            out = jax.block_until_ready(out)
            ref = _iou_loss_ref(pred, target, reduction=reduction, loss_type=loss_type)
            if not jnp.allclose(out, ref, atol=1e-4, rtol=1e-4):
                ok = False

    # SoA fast path (producer emits (4, N) boxes; no transpose pass).
    out = iou_loss_soa(pred.T, target.T, reduction="mean", loss_type="giou")
    out = jax.block_until_ready(out)
    ref = _iou_loss_ref(pred, target, reduction="mean", loss_type="giou")
    if not jnp.allclose(out, ref, atol=1e-4, rtol=1e-4):
        ok = False

    if ok:
        print("KERNEL_OK")
    else:
        print("KERNEL_MISMATCH")
</pallas_src>

<mosaic_0001>
module attributes {stable_mosaic.version = 11 : i64} {
  func.func @_iou_loss_kernel(%arg0: i32, %arg1: memref<4x8x128xf32, #tpu.memory_space<vmem>>, %arg2: memref<4x8x128xf32, #tpu.memory_space<vmem>>, %arg3: memref<8x128xf32, #tpu.memory_space<vmem>>) attributes {dimension_semantics = [#tpu.dimension_semantics<parallel>], iteration_bounds = array<i64: 1>, scalar_prefetch = 0 : i64, scratch_operands = 0 : i64, tpu.core_type = #tpu.core_type<tc>, window_params = [{transform_indices = @transform_0, window_bounds = array<i64: 4, 8, 128>}, {transform_indices = @transform_1, window_bounds = array<i64: 4, 8, 128>}, {transform_indices = @transform_2, window_bounds = array<i64: 8, 128>}]} {
    %c0 = arith.constant 0 : index
    %c0_0 = arith.constant 0 : index
    %c0_1 = arith.constant 0 : index
    %0 = vector.load %arg1[%c0, %c0_0, %c0_1] : memref<4x8x128xf32, #tpu.memory_space<vmem>>, vector<1x8x128xf32>
    %1 = vector.shape_cast %0 : vector<1x8x128xf32> to vector<8x128xf32>
    %c1 = arith.constant 1 : index
    %c0_2 = arith.constant 0 : index
    %c0_3 = arith.constant 0 : index
    %2 = vector.load %arg1[%c1, %c0_2, %c0_3] : memref<4x8x128xf32, #tpu.memory_space<vmem>>, vector<1x8x128xf32>
    %3 = vector.shape_cast %2 : vector<1x8x128xf32> to vector<8x128xf32>
    %c2 = arith.constant 2 : index
    %c0_4 = arith.constant 0 : index
    %c0_5 = arith.constant 0 : index
    %4 = vector.load %arg1[%c2, %c0_4, %c0_5] : memref<4x8x128xf32, #tpu.memory_space<vmem>>, vector<1x8x128xf32>
    %5 = vector.shape_cast %4 : vector<1x8x128xf32> to vector<8x128xf32>
    %c3 = arith.constant 3 : index
    %c0_6 = arith.constant 0 : index
    %c0_7 = arith.constant 0 : index
    %6 = vector.load %arg1[%c3, %c0_6, %c0_7] : memref<4x8x128xf32, #tpu.memory_space<vmem>>, vector<1x8x128xf32>
    %7 = vector.shape_cast %6 : vector<1x8x128xf32> to vector<8x128xf32>
    %c0_8 = arith.constant 0 : index
    %c0_9 = arith.constant 0 : index
    %c0_10 = arith.constant 0 : index
    %8 = vector.load %arg2[%c0_8, %c0_9, %c0_10] : memref<4x8x128xf32, #tpu.memory_space<vmem>>, vector<1x8x128xf32>
    %9 = vector.shape_cast %8 : vector<1x8x128xf32> to vector<8x128xf32>
    %c1_11 = arith.constant 1 : index
    %c0_12 = arith.constant 0 : index
    %c0_13 = arith.constant 0 : index
    %10 = vector.load %arg2[%c1_11, %c0_12, %c0_13] : memref<4x8x128xf32, #tpu.memory_space<vmem>>, vector<1x8x128xf32>
    %11 = vector.shape_cast %10 : vector<1x8x128xf32> to vector<8x128xf32>
    %c2_14 = arith.constant 2 : index
    %c0_15 = arith.constant 0 : index
    %c0_16 = arith.constant 0 : index
    %12 = vector.load %arg2[%c2_14, %c0_15, %c0_16] : memref<4x8x128xf32, #tpu.memory_space<vmem>>, vector<1x8x128xf32>
    %13 = vector.shape_cast %12 : vector<1x8x128xf32> to vector<8x128xf32>
    %c3_17 = arith.constant 3 : index
    %c0_18 = arith.constant 0 : index
    %c0_19 = arith.constant 0 : index
    %14 = vector.load %arg2[%c3_17, %c0_18, %c0_19] : memref<4x8x128xf32, #tpu.memory_space<vmem>>, vector<1x8x128xf32>
    %15 = vector.shape_cast %14 : vector<1x8x128xf32> to vector<8x128xf32>
    %cst = arith.constant 5.000000e-01 : f32
    %16 = vector.broadcast %cst : f32 to vector<8x128xf32>
    %17 = arith.mulf %5, %16 : vector<8x128xf32>
    %cst_20 = arith.constant 5.000000e-01 : f32
    %18 = vector.broadcast %cst_20 : f32 to vector<8x128xf32>
    %19 = arith.mulf %7, %18 : vector<8x128xf32>
    %cst_21 = arith.constant 5.000000e-01 : f32
    %20 = vector.broadcast %cst_21 : f32 to vector<8x128xf32>
    %21 = arith.mulf %13, %20 : vector<8x128xf32>
    %cst_22 = arith.constant 5.000000e-01 : f32
    %22 = vector.broadcast %cst_22 : f32 to vector<8x128xf32>
    %23 = arith.mulf %15, %22 : vector<8x128xf32>
    %24 = arith.subf %1, %17 : vector<8x128xf32>
    %25 = arith.addf %1, %17 : vector<8x128xf32>
    %26 = arith.subf %3, %19 : vector<8x128xf32>
    %27 = arith.addf %3, %19 : vector<8x128xf32>
    %28 = arith.subf %9, %21 : vector<8x128xf32>
    %29 = arith.addf %9, %21 : vector<8x128xf32>
    %30 = arith.subf %11, %23 : vector<8x128xf32>
    %31 = arith.addf %11, %23 : vector<8x128xf32>
    %32 = arith.minimumf %25, %29 : vector<8x128xf32>
    %33 = arith.maximumf %24, %28 : vector<8x128xf32>
    %34 = arith.subf %32, %33 : vector<8x128xf32>
    %cst_23 = arith.constant 0.000000e+00 : f32
    %35 = vector.broadcast %cst_23 : f32 to vector<8x128xf32>
    %36 = arith.maximumf %34, %35 : vector<8x128xf32>
    %37 = arith.minimumf %27, %31 : vector<8x128xf32>
    %38 = arith.maximumf %26, %30 : vector<8x128xf32>
    %39 = arith.subf %37, %38 : vector<8x128xf32>
    %cst_24 = arith.constant 0.000000e+00 : f32
    %40 = vector.broadcast %cst_24 : f32 to vector<8x128xf32>
    %41 = arith.maximumf %39, %40 : vector<8x128xf32>
    %42 = arith.mulf %36, %41 : vector<8x128xf32>
    %43 = arith.mulf %5, %7 : vector<8x128xf32>
    %44 = arith.mulf %13, %15 : vector<8x128xf32>
    %45 = arith.addf %43, %44 : vector<8x128xf32>
    %46 = arith.subf %45, %42 : vector<8x128xf32>
    %cst_25 = arith.constant 1.000000e-16 : f32
    %47 = vector.broadcast %cst_25 : f32 to vector<8x128xf32>
    %48 = arith.addf %46, %47 : vector<8x128xf32>
    %49 = tpu.reciprocal %48 {approx = true} : vector<8x128xf32> -> vector<8x128xf32>
    %50 = arith.mulf %48, %49 : vector<8x128xf32>
    %cst_26 = arith.constant 2.000000e+00 : f32
    %51 = vector.broadcast %cst_26 : f32 to vector<8x128xf32>
    %52 = arith.subf %51, %50 : vector<8x128xf32>
    %53 = arith.mulf %49, %52 : vector<8x128xf32>
    %54 = arith.mulf %42, %53 : vector<8x128xf32>
    %55 = arith.mulf %54, %54 : vector<8x128xf32>
    %cst_27 = arith.constant 1.000000e+00 : f32
    %56 = vector.broadcast %cst_27 : f32 to vector<8x128xf32>
    %57 = arith.subf %56, %55 : vector<8x128xf32>
    %c0_28 = arith.constant 0 : index
    %c0_29 = arith.constant 0 : index
    %58 = vector.load %arg3[%c0_28, %c0_29] : memref<8x128xf32, #tpu.memory_space<vmem>>, vector<8x128xf32>
    tpu.vector_store %arg3[%c0_28, %c0_29], %57 {strides = array<i32>} : memref<8x128xf32, #tpu.memory_space<vmem>>, vector<8x128xf32>,
    return
  }
  func.func @transform_0(%arg0: i32) -> (i32, i32, i32) {
    %c0_i32 = arith.constant 0 : i32
    %c0_i32_0 = arith.constant 0 : i32
    %c0_i32_1 = arith.constant 0 : i32
    return %c0_i32, %arg0, %c0_i32_0 : i32, i32, i32
  }
  func.func @transform_1(%arg0: i32) -> (i32, i32, i32) {
    %c0_i32 = arith.constant 0 : i32
    %c0_i32_0 = arith.constant 0 : i32
    %c0_i32_1 = arith.constant 0 : i32
    return %c0_i32, %arg0, %c0_i32_0 : i32, i32, i32
  }
  func.func @transform_2(%arg0: i32) -> (i32, i32) {
    %c0_i32 = arith.constant 0 : i32
    %c0_i32_0 = arith.constant 0 : i32
    return %arg0, %c0_i32 : i32, i32
  }
}

</mosaic_0001>

<bundles_post_ra>
// kernel: iou_loss.1
= control target key start
LH: loop header
LB: loop body
LE: loop exit
PB: predicated region body
PF: predicated region fallthrough
CT: control target
= control target key end

     0   :  { %s113_s0 = inlined_call_operand.vmem [shape: f32[4,8,128], index: 0, kind: input, shape index: {}]   ;;  %s114_s1 = inlined_call_operand.vmem [shape: f32[4,8,128], index: 1, kind: input, shape index: {}]   ;;  %s115_s2 = inlined_call_operand.vmem [shape: f32[8,128], index: 2, kind: output, shape index: {}]  }
   0x1   :  { %v11_v0 = vld [vmem:[%s113_s0] sm:$0xff]  ;;  %v64_v1 = vld [vmem:[%s113_s0 + $0x10] sm:$0xff]  ;;  %v63_v2 = vld [vmem:[%s113_s0 + $0x8] sm:$0xff] }
   0x2   :  { %v65_v3 = vld [vmem:[%s113_s0 + $0x18] sm:$0xff]  ;;  %v18_v4 = vld [vmem:[%s114_s1] sm:$0xff]  ;;  %v25_v5 = vmul.f32 0.5, %v64_v1  ;;  %v66_v6 = vld [vmem:[%s114_s1 + $0x8] sm:$0xff] }
   0x3   :  { %v67_v7 = vld [vmem:[%s114_s1 + $0x10] sm:$0xff]  ;;  %v68_v8 = vld [vmem:[%s114_s1 + $0x18] sm:$0xff]  ;;  %v26_v9 = vmul.f32 0.5, %v65_v3  ;;  %v46_v20 = vmul.f32 %v65_v3, %v64_v1 }
   0x4   :  { %v27_v10 = vmul.f32 0.5, %v67_v7  ;;  %v28_v11 = vmul.f32 0.5, %v68_v8  ;;  %v29_v12 = vsub.f32 %v11_v0, %v25_v5  ;;  %v30_v13 = vadd.f32 %v25_v5, %v11_v0 }
   0x5   :  { %v31_v14 = vsub.f32 %v63_v2, %v26_v9  ;;  %v32_v15 = vadd.f32 %v63_v2, %v26_v9  ;;  %v47_v21 = vmul.f32 %v68_v8, %v67_v7 }
   0x6   :  { %v33_v16 = vsub.f32 %v18_v4, %v27_v10  ;;  %v34_v17 = vadd.f32 %v27_v10, %v18_v4  ;;  %v35_v18 = vsub.f32 %v66_v6, %v28_v11  ;;  %v36_v19 = vadd.f32 %v66_v6, %v28_v11 }
   0x7   :  { %v48_v30 = vadd.f32 %v47_v21, %v46_v20 }
   0x8   :  { %v37_v22 = vmin.f32 %v30_v13, %v34_v17  ;;  %v38_v23 = vmax.f32 %v29_v12, %v33_v16  ;;  %v41_v24 = vmin.f32 %v32_v15, %v36_v19  ;;  %v42_v25 = vmax.f32 %v31_v14, %v35_v18 }
   0xa   :  { %v39_v26 = vsub.f32 %v37_v22, %v38_v23  ;;  %v43_v27 = vsub.f32 %v41_v24, %v42_v25 }
   0xc   :  { %v40_v28 = vmax.f32 %v39_v26, 0.0  ;;  %v44_v29 = vmax.f32 %v43_v27, 0.0 }
   0xe   :  { %v45_v31 = vmul.f32 %v44_v29, %v40_v28 }
  0x10   :  { %v49_v32 = vsub.f32 %v48_v30, %v45_v31 }
  0x12   :  { %v50_v33 = vadd.f32 1e-16, %v49_v32 }
  0x14   :  { %69 = vrcp.f32 %v50_v33 }
  0x1e   :  { %v70_v34 = vpop.eup %69 }
  0x1f   :  { %v52_v35 = vmul.f32 %v70_v34, %v50_v33 }
  0x21   :  { %v53_v36 = vsub.f32 2.0, %v52_v35 }
  0x23   :  { %v54_v37 = vmul.f32 %v70_v34, %v53_v36 }
  0x25   :  { %v55_v38 = vmul.f32 %v54_v37, %v45_v31 }
  0x27   :  { %v56_v39 = vmul.f32 %v55_v38, %v55_v38 }
  0x29   :  { %v57_v40 = vsub.f32 1.0, %v56_v39 }
  0x2b   :  { %58 = vst [vmem:[%s115_s2] sm:$0xff] %v57_v40 }

</bundles_post_ra>
